<compile_context>
chip_gen: v7x
topology: tpu7x:2x2x1
jax: 0.10.0
libtpu: 0.0.40
codegen_flags: <defaults>
</compile_context>

<pallas_src>
import functools
import math

import jax
import jax.numpy as jnp
from jax.experimental import pallas as pl
from jax.experimental.pallas import tpu as pltpu


def _fused_unpool_kernel(x_ref, w1_ref, b1_ref, w2_ref, b2_ref, o_ref, *, width):
    """conv1(1x1) -> maxpool2x2(+indices) -> conv2(1x1) -> max_unpool2x2.

    x_ref : (Cin, LT)  flat NCHW lanes of one image slab (LT is a multiple of
                       2*width, so every 2x2 pooling window lives entirely in
                       the block: lane l = h*width + w, di = h%2, dj = w%2).
    w1    : (C1, Cin), b1: (C1, 1), w2: (C2, C1), b2: (C2, 1)   (VMEM)
    o_ref : (C2, LT)   same flat layout.
    """
    W = width
    x = x_ref[...]

    # conv1 (1x1) == per-pixel channel mix: tiny MXU matmul (C1, Cin) @ (Cin, LT).
    y = jnp.dot(w1_ref[...], x, preferred_element_type=jnp.float32) + b1_ref[...]

    C1, LT = y.shape
    lane = jax.lax.broadcasted_iota(jnp.int32, (C1, LT), 1)
    pos = lane % (2 * W)            # position inside the (even-row, odd-row) lane block
    is_dj0 = (lane % 2) == 0        # even column  -> window position (*, 0)
    is_di0 = pos < W                # even row     -> window position (0, *)

    def window_bcast_max(a):
        # Max over the 4 lanes of each 2x2 pooling window, broadcast back to
        # those 4 lanes.  Positive shifts only; wrapped values are never
        # selected because LT is a multiple of 2*W.
        pair = jnp.where(is_dj0,
                         pltpu.roll(a, LT - 1, axis=1),   # a[l+1] for even cols
                         pltpu.roll(a, 1, axis=1))        # a[l-1] for odd cols
        pmax = jnp.maximum(a, pair)
        rowp = jnp.where(is_di0,
                         pltpu.roll(pmax, LT - W, axis=1),  # a[l+W] for even rows
                         pltpu.roll(pmax, W, axis=1))       # a[l-W] for odd rows
        return jnp.maximum(pmax, rowp)

    # ---- MaxPool2d(2,2): window max, broadcast to all 4 lanes of the window ----
    m = window_bcast_max(y)

    # ---- argmax with first-max tie-break in (0,0),(0,1),(1,0),(1,1) order ----
    # Encode a per-position priority, keep it only where y hits the max, and
    # take the window max of those priorities; the winner lane matches it.
    prio = jnp.where(is_di0,
                     jnp.where(is_dj0, 4.0, 3.0),
                     jnp.where(is_dj0, 2.0, 1.0)).astype(jnp.float32)
    flag = jnp.where(y == m, prio, 0.0)
    fm = window_bcast_max(flag)
    selected = flag == fm           # exactly one lane per 2x2 window, per channel

    # conv2 (1x1) on the pooled max (valid at every lane of its window):
    # (C2, C1) @ (C1, LT)
    conv = jnp.dot(w2_ref[...], m, preferred_element_type=jnp.float32) + b2_ref[...]

    # MaxUnpool2d(2,2): conv value at the recorded argmax lane, zero elsewhere.
    o_ref[...] = jnp.where(selected, conv, 0.0)


def _choose_lane_tile(HW, W, N):
    """Pick the lane tile: multiple of lcm(2W,128) dividing H*W, <=1024 lanes,
    preferring >= 8 total grid steps (>= 4 per TensorCore on v7x)."""
    unit = (2 * W) * 128 // math.gcd(2 * W, 128)     # whole row-pairs + lane-dense
    if HW % unit != 0:
        return HW                                    # awkward shapes: whole image per step
    n_units = HW // unit
    cands = [d * unit for d in range(1, n_units + 1) if n_units % d == 0]
    # 1024-lane cap: ~6 live (4, LT) f32 slabs stay within the 64-vreg file
    # (no spill on v5e/v6e/v7x); kernel is HBM-bound so bigger tiles buy little.
    cap = 1024
    good = [c for c in cands if c <= cap] or [cands[0]]
    lt = max(good)
    while N * (HW // lt) < 8:
        smaller = [c for c in good if c < lt]
        if not smaller:
            break
        lt = max(smaller)
    return lt


@functools.partial(jax.jit, static_argnames=("mode",))
def my_model_forward(x_nchw, w1, b1, w2, b2, mode="default"):
    """Forward pass of MyModel.

    x_nchw: (N, 3, H, W) float32, H and W even.
    w1: (4, 3) conv1 1x1 weight (out, in);  b1: (4,)
    w2: (4, 4) conv2 1x1 weight (out, in);  b2: (4,)
    Returns (N, 4, H, W) float32.  For even H, W the 'default' and
    'dynamic_size' modes are numerically identical (unpool output size equals
    the conv1 input size); both are supported here.
    """
    if mode not in ("default", "dynamic_size"):
        raise Exception("Unknown mode: " + mode)

    N, Cin, H, W = x_nchw.shape
    C1, C2 = w1.shape[0], w2.shape[0]
    assert H % 2 == 0 and W % 2 == 0, "MaxPool2d(2,2)/MaxUnpool2d(2,2) need even H, W"
    assert C1 == C2, "unpool indices channel must match conv2 output channel"

    HW = H * W
    LT = _choose_lane_tile(HW, W, N)
    grid = (N, HW // LT)

    # Zero-copy views: NCHW is already (N, C, H*W) row-major; no transpose, no pad.
    x_flat = x_nchw.reshape(N, Cin, HW).astype(jnp.float32)
    w1f = w1.astype(jnp.float32)
    b1c = b1.astype(jnp.float32).reshape(C1, 1)
    w2f = w2.astype(jnp.float32)
    b2c = b2.astype(jnp.float32).reshape(C2, 1)

    out_flat = pl.pallas_call(
        functools.partial(_fused_unpool_kernel, width=W),
        grid=grid,
        in_specs=[
            pl.BlockSpec((None, Cin, LT), lambda n, j: (n, 0, j)),
            pl.BlockSpec((C1, Cin), lambda n, j: (0, 0)),
            pl.BlockSpec((C1, 1), lambda n, j: (0, 0)),
            pl.BlockSpec((C2, C1), lambda n, j: (0, 0)),
            pl.BlockSpec((C2, 1), lambda n, j: (0, 0)),
        ],
        out_specs=pl.BlockSpec((None, C2, LT), lambda n, j: (n, 0, j)),
        out_shape=jax.ShapeDtypeStruct((N, C2, HW), jnp.float32),
        compiler_params=pltpu.CompilerParams(
            dimension_semantics=("parallel", "parallel")),
    )(x_flat, w1f, b1c, w2f, b2c)

    return out_flat.reshape(N, C2, H, W)    # zero-copy view back to NCHW


def _ref_forward(x, w1, b1, w2, b2):
    """Pure-JAX reference replicating PyTorch semantics (NCHW)."""
    y = jnp.einsum('nchw,oc->nohw', x, w1) + b1[None, :, None, None]
    N, C, H, W = y.shape
    yw = y.reshape(N, C, H // 2, 2, W // 2, 2)
    m = yw.max(axis=(3, 5))                                      # pooled (N,C,H2,W2)
    conv = jnp.einsum('nchw,oc->nohw', m, w2) + b2[None, :, None, None]
    y00 = yw[:, :, :, 0, :, 0]; y01 = yw[:, :, :, 0, :, 1]
    y10 = yw[:, :, :, 1, :, 0]; y11 = yw[:, :, :, 1, :, 1]
    s00 = y00 == m
    s01 = (~s00) & (y01 == m)
    s10 = (~s00) & (~s01) & (y10 == m)
    s11 = ~(s00 | s01 | s10)
    out = jnp.zeros((N, conv.shape[1], H // 2, 2, W // 2, 2), jnp.float32)
    out = out.at[:, :, :, 0, :, 0].set(jnp.where(s00, conv, 0.0))
    out = out.at[:, :, :, 0, :, 1].set(jnp.where(s01, conv, 0.0))
    out = out.at[:, :, :, 1, :, 0].set(jnp.where(s10, conv, 0.0))
    out = out.at[:, :, :, 1, :, 1].set(jnp.where(s11, conv, 0.0))
    return out.reshape(N, conv.shape[1], H, W)


if __name__ == "__main__":
    key = jax.random.PRNGKey(0)
    kx, k1, kb1, k2, kb2 = jax.random.split(key, 5)

    # Deterministic synthetic parameters (shapes from nn.Conv2d(3,4,1) / (4,4,1)).
    w1 = 0.1 * jax.random.normal(k1, (4, 3), dtype=jnp.float32)
    b1 = 0.1 * jax.random.normal(kb1, (4,), dtype=jnp.float32)
    w2 = 0.1 * jax.random.normal(k2, (4, 4), dtype=jnp.float32)
    b2 = 0.1 * jax.random.normal(kb2, (4,), dtype=jnp.float32)

    # Small shape (H*W = 256 -> 128-lane tiles, grid (2, 2)).
    N, Cin, H, W = 2, 3, 16, 16
    x = jax.random.normal(kx, (N, Cin, H, W), dtype=jnp.float32)
    out = jax.block_until_ready(my_model_forward(x, w1, b1, w2, b2, mode="default"))
    ref = _ref_forward(x, w1, b1, w2, b2)
    assert out.shape == (N, 4, H, W)
    assert jnp.allclose(out, ref, atol=1e-5, rtol=1e-5), "mismatch vs reference (small)"

    # Larger shape exercising 1024-lane tiles and a 16-step grid.
    x2 = jax.random.normal(kx, (4, Cin, 64, 64), dtype=jnp.float32)
    out2 = jax.block_until_ready(my_model_forward(x2, w1, b1, w2, b2, mode="dynamic_size"))
    ref2 = _ref_forward(x2, w1, b1, w2, b2)
    assert out2.shape == (4, 4, 64, 64)
    assert jnp.allclose(out2, ref2, atol=1e-5, rtol=1e-5), "mismatch vs reference (large)"

    print("KERNEL_OK")
</pallas_src>

<mosaic_0001>
module attributes {stable_mosaic.version = 11 : i64} {
  func.func @_fused_unpool_kernel(%arg0: i32, %arg1: i32, %arg2: memref<1x3x128xf32, #tpu.memory_space<vmem>>, %arg3: memref<4x3xf32, #tpu.memory_space<vmem>>, %arg4: memref<4x1xf32, #tpu.memory_space<vmem>>, %arg5: memref<4x4xf32, #tpu.memory_space<vmem>>, %arg6: memref<4x1xf32, #tpu.memory_space<vmem>>, %arg7: memref<1x4x128xf32, #tpu.memory_space<vmem>>) attributes {dimension_semantics = [#tpu.dimension_semantics<parallel>, #tpu.dimension_semantics<parallel>], iteration_bounds = array<i64: 2, 2>, scalar_prefetch = 0 : i64, scratch_operands = 0 : i64, tpu.core_type = #tpu.core_type<tc>, window_params = [{transform_indices = @transform_0, window_bounds = array<i64: 1, 3, 128>}, {pipeline_mode = #tpu.pipeline_mode<synchronous>, transform_indices = @transform_1, window_bounds = array<i64: 4, 3>}, {pipeline_mode = #tpu.pipeline_mode<synchronous>, transform_indices = @transform_2, window_bounds = array<i64: 4, 1>}, {pipeline_mode = #tpu.pipeline_mode<synchronous>, transform_indices = @transform_3, window_bounds = array<i64: 4, 4>}, {pipeline_mode = #tpu.pipeline_mode<synchronous>, transform_indices = @transform_4, window_bounds = array<i64: 4, 1>}, {transform_indices = @transform_5, window_bounds = array<i64: 1, 4, 128>}]} {
    %c0 = arith.constant 0 : index
    %c0_0 = arith.constant 0 : index
    %c0_1 = arith.constant 0 : index
    %0 = vector.load %arg2[%c0, %c0_0, %c0_1] : memref<1x3x128xf32, #tpu.memory_space<vmem>>, vector<1x3x128xf32>
    %1 = vector.shape_cast %0 : vector<1x3x128xf32> to vector<3x128xf32>
    %c0_2 = arith.constant 0 : index
    %c0_3 = arith.constant 0 : index
    %2 = vector.load %arg3[%c0_2, %c0_3] : memref<4x3xf32, #tpu.memory_space<vmem>>, vector<4x3xf32>
    %cst = arith.constant dense<0.000000e+00> : vector<4x128xf32>
    %3 = tpu.matmul %2, %1, %cst {dimension_numbers = #tpu.dot_dimension_numbers<[1], [0], [0], [1], [0, 0, 1, 1], [], []>} : vector<4x3xf32>, vector<3x128xf32>, vector<4x128xf32> -> vector<4x128xf32>
    %c0_4 = arith.constant 0 : index
    %c0_5 = arith.constant 0 : index
    %4 = vector.load %arg4[%c0_4, %c0_5] : memref<4x1xf32, #tpu.memory_space<vmem>>, vector<4x1xf32>
    %5 = vector.broadcast %4 : vector<4x1xf32> to vector<4x128xf32>
    %6 = arith.addf %3, %5 : vector<4x128xf32>
    %7 = tpu.iota {dimensions = array<i32: 1>} : vector<4x128xi32>
    %c32_i32 = arith.constant 32 : i32
    %c0_i32 = arith.constant 0 : i32
    %8 = arith.cmpi eq, %c32_i32, %c0_i32 : i32
    %c1_i32 = arith.constant 1 : i32
    %9 = arith.select %8, %c1_i32, %c32_i32 : i32
    %10 = vector.broadcast %9 : i32 to vector<4x128xi32>
    %11 = arith.remsi %7, %10 : vector<4x128xi32>
    %c0_i32_6 = arith.constant 0 : i32
    %12 = vector.broadcast %c0_i32_6 : i32 to vector<4x128xi32>
    %13 = arith.cmpi ne, %11, %12 : vector<4x128xi32>
    %c0_i32_7 = arith.constant 0 : i32
    %14 = vector.broadcast %c0_i32_7 : i32 to vector<4x128xi32>
    %15 = arith.cmpi slt, %11, %14 : vector<4x128xi32>
    %c0_i32_8 = arith.constant 0 : i32
    %16 = arith.cmpi slt, %9, %c0_i32_8 : i32
    %17 = vector.broadcast %16 : i1 to vector<4x128xi1>
    %18 = vector.broadcast %17 : vector<4x128xi1> to vector<4x128xi1>
    %19 = arith.xori %15, %18 : vector<4x128xi1>
    %20 = arith.andi %19, %13 : vector<4x128xi1>
    %21 = vector.broadcast %9 : i32 to vector<4x128xi32>
    %22 = arith.addi %11, %21 : vector<4x128xi32>
    %23 = arith.select %20, %22, %11 : vector<4x128xi1>, vector<4x128xi32>
    %c2_i32 = arith.constant 2 : i32
    %c0_i32_9 = arith.constant 0 : i32
    %24 = arith.cmpi eq, %c2_i32, %c0_i32_9 : i32
    %c1_i32_10 = arith.constant 1 : i32
    %25 = arith.select %24, %c1_i32_10, %c2_i32 : i32
    %26 = vector.broadcast %25 : i32 to vector<4x128xi32>
    %27 = arith.remsi %7, %26 : vector<4x128xi32>
    %c0_i32_11 = arith.constant 0 : i32
    %28 = vector.broadcast %c0_i32_11 : i32 to vector<4x128xi32>
    %29 = arith.cmpi ne, %27, %28 : vector<4x128xi32>
    %c0_i32_12 = arith.constant 0 : i32
    %30 = vector.broadcast %c0_i32_12 : i32 to vector<4x128xi32>
    %31 = arith.cmpi slt, %27, %30 : vector<4x128xi32>
    %c0_i32_13 = arith.constant 0 : i32
    %32 = arith.cmpi slt, %25, %c0_i32_13 : i32
    %33 = vector.broadcast %32 : i1 to vector<4x128xi1>
    %34 = vector.broadcast %33 : vector<4x128xi1> to vector<4x128xi1>
    %35 = arith.xori %31, %34 : vector<4x128xi1>
    %36 = arith.andi %35, %29 : vector<4x128xi1>
    %37 = vector.broadcast %25 : i32 to vector<4x128xi32>
    %38 = arith.addi %27, %37 : vector<4x128xi32>
    %39 = arith.select %36, %38, %27 : vector<4x128xi1>, vector<4x128xi32>
    %c0_i32_14 = arith.constant 0 : i32
    %40 = vector.broadcast %c0_i32_14 : i32 to vector<4x128xi32>
    %41 = arith.cmpi eq, %39, %40 : vector<4x128xi32>
    %c16_i32 = arith.constant 16 : i32
    %42 = vector.broadcast %c16_i32 : i32 to vector<4x128xi32>
    %43 = arith.cmpi slt, %23, %42 : vector<4x128xi32>
    %c127_i32 = arith.constant 127 : i32
    %44 = tpu.dynamic_rotate %6 by %c127_i32 dim 1 : vector<4x128xf32>, i32 -> vector<4x128xf32>
    %c1_i32_15 = arith.constant 1 : i32
    %45 = tpu.dynamic_rotate %6 by %c1_i32_15 dim 1 : vector<4x128xf32>, i32 -> vector<4x128xf32>
    %46 = arith.select %41, %44, %45 : vector<4x128xi1>, vector<4x128xf32>
    %47 = arith.maximumf %6, %46 : vector<4x128xf32>
    %c112_i32 = arith.constant 112 : i32
    %48 = tpu.dynamic_rotate %47 by %c112_i32 dim 1 : vector<4x128xf32>, i32 -> vector<4x128xf32>
    %c16_i32_16 = arith.constant 16 : i32
    %49 = tpu.dynamic_rotate %47 by %c16_i32_16 dim 1 : vector<4x128xf32>, i32 -> vector<4x128xf32>
    %50 = arith.select %43, %48, %49 : vector<4x128xi1>, vector<4x128xf32>
    %51 = arith.maximumf %47, %50 : vector<4x128xf32>
    %cst_17 = arith.constant 4.000000e+00 : f32
    %cst_18 = arith.constant 3.000000e+00 : f32
    %52 = vector.broadcast %cst_17 : f32 to vector<4x128xf32>
    %53 = vector.broadcast %cst_18 : f32 to vector<4x128xf32>
    %54 = arith.select %41, %52, %53 : vector<4x128xi1>, vector<4x128xf32>
    %cst_19 = arith.constant 2.000000e+00 : f32
    %cst_20 = arith.constant 1.000000e+00 : f32
    %55 = vector.broadcast %cst_19 : f32 to vector<4x128xf32>
    %56 = vector.broadcast %cst_20 : f32 to vector<4x128xf32>
    %57 = arith.select %41, %55, %56 : vector<4x128xi1>, vector<4x128xf32>
    %58 = arith.select %43, %54, %57 : vector<4x128xi1>, vector<4x128xf32>
    %59 = arith.cmpf oeq, %6, %51 : vector<4x128xf32>
    %cst_21 = arith.constant 0.000000e+00 : f32
    %60 = vector.broadcast %cst_21 : f32 to vector<4x128xf32>
    %61 = arith.select %59, %58, %60 : vector<4x128xi1>, vector<4x128xf32>
    %c127_i32_22 = arith.constant 127 : i32
    %62 = tpu.dynamic_rotate %61 by %c127_i32_22 dim 1 : vector<4x128xf32>, i32 -> vector<4x128xf32>
    %c1_i32_23 = arith.constant 1 : i32
    %63 = tpu.dynamic_rotate %61 by %c1_i32_23 dim 1 : vector<4x128xf32>, i32 -> vector<4x128xf32>
    %64 = arith.select %41, %62, %63 : vector<4x128xi1>, vector<4x128xf32>
    %65 = arith.maximumf %61, %64 : vector<4x128xf32>
    %c112_i32_24 = arith.constant 112 : i32
    %66 = tpu.dynamic_rotate %65 by %c112_i32_24 dim 1 : vector<4x128xf32>, i32 -> vector<4x128xf32>
    %c16_i32_25 = arith.constant 16 : i32
    %67 = tpu.dynamic_rotate %65 by %c16_i32_25 dim 1 : vector<4x128xf32>, i32 -> vector<4x128xf32>
    %68 = arith.select %43, %66, %67 : vector<4x128xi1>, vector<4x128xf32>
    %69 = arith.maximumf %65, %68 : vector<4x128xf32>
    %70 = arith.cmpf oeq, %61, %69 : vector<4x128xf32>
    %c0_26 = arith.constant 0 : index
    %c0_27 = arith.constant 0 : index
    %71 = vector.load %arg5[%c0_26, %c0_27] : memref<4x4xf32, #tpu.memory_space<vmem>>, vector<4x4xf32>
    %cst_28 = arith.constant dense<0.000000e+00> : vector<4x128xf32>
    %72 = tpu.matmul %71, %51, %cst_28 {dimension_numbers = #tpu.dot_dimension_numbers<[1], [0], [0], [1], [0, 0, 1, 1], [], []>} : vector<4x4xf32>, vector<4x128xf32>, vector<4x128xf32> -> vector<4x128xf32>
    %c0_29 = arith.constant 0 : index
    %c0_30 = arith.constant 0 : index
    %73 = vector.load %arg6[%c0_29, %c0_30] : memref<4x1xf32, #tpu.memory_space<vmem>>, vector<4x1xf32>
    %74 = vector.broadcast %73 : vector<4x1xf32> to vector<4x128xf32>
    %75 = arith.addf %72, %74 : vector<4x128xf32>
    %cst_31 = arith.constant 0.000000e+00 : f32
    %76 = vector.broadcast %cst_31 : f32 to vector<4x128xf32>
    %77 = arith.select %70, %75, %76 : vector<4x128xi1>, vector<4x128xf32>
    %c0_32 = arith.constant 0 : index
    %c0_33 = arith.constant 0 : index
    %c0_34 = arith.constant 0 : index
    %78 = vector.load %arg7[%c0_32, %c0_33, %c0_34] : memref<1x4x128xf32, #tpu.memory_space<vmem>>, vector<1x4x128xf32>
    %79 = vector.shape_cast %78 : vector<1x4x128xf32> to vector<4x128xf32>
    %80 = vector.shape_cast %77 : vector<4x128xf32> to vector<1x4x128xf32>
    tpu.vector_store %arg7[%c0_32, %c0_33, %c0_34], %80 {strides = array<i32>} : memref<1x4x128xf32, #tpu.memory_space<vmem>>, vector<1x4x128xf32>,
    return
  }
  func.func @transform_0(%arg0: i32, %arg1: i32) -> (i32, i32, i32) {
    %c0_i32 = arith.constant 0 : i32
    %c0_i32_0 = arith.constant 0 : i32
    return %arg0, %c0_i32, %arg1 : i32, i32, i32
  }
  func.func @transform_1(%arg0: i32, %arg1: i32) -> (i32, i32) {
    %c0_i32 = arith.constant 0 : i32
    %c0_i32_0 = arith.constant 0 : i32
    %c0_i32_1 = arith.constant 0 : i32
    return %c0_i32, %c0_i32_0 : i32, i32
  }
  func.func @transform_2(%arg0: i32, %arg1: i32) -> (i32, i32) {
    %c0_i32 = arith.constant 0 : i32
    %c0_i32_0 = arith.constant 0 : i32
    %c0_i32_1 = arith.constant 0 : i32
    return %c0_i32, %c0_i32_0 : i32, i32
  }
  func.func @transform_3(%arg0: i32, %arg1: i32) -> (i32, i32) {
    %c0_i32 = arith.constant 0 : i32
    %c0_i32_0 = arith.constant 0 : i32
    %c0_i32_1 = arith.constant 0 : i32
    return %c0_i32, %c0_i32_0 : i32, i32
  }
  func.func @transform_4(%arg0: i32, %arg1: i32) -> (i32, i32) {
    %c0_i32 = arith.constant 0 : i32
    %c0_i32_0 = arith.constant 0 : i32
    %c0_i32_1 = arith.constant 0 : i32
    return %c0_i32, %c0_i32_0 : i32, i32
  }
  func.func @transform_5(%arg0: i32, %arg1: i32) -> (i32, i32, i32) {
    %c0_i32 = arith.constant 0 : i32
    %c0_i32_0 = arith.constant 0 : i32
    return %arg0, %c0_i32, %arg1 : i32, i32, i32
  }
}

</mosaic_0001>

<bundles_post_ra>
// kernel: my_model_forward.1
= control target key start
LH: loop header
LB: loop body
LE: loop exit
PB: predicated region body
PF: predicated region fallthrough
CT: control target
= control target key end

     0   :  { %s732_s18 = smov 0   ;;  %s734_s19 = smov 0   ;;  %s828_s0 = inlined_call_operand.vmem [shape: f32[2,3,256], index: 0, kind: input, shape index: {}]   ;;  %s829_s1 = inlined_call_operand.vmem [shape: f32[4,3], index: 1, kind: input, shape index: {}]   ;;  %s830_s2 = inlined_call_operand.vmem [shape: f32[4,1], index: 2, kind: input, shape index: {}]   ;;  %s831_s3 = inlined_call_operand.vmem [shape: f32[4,4], index: 3, kind: input, shape index: {}]   ;;  %s832_s4 = inlined_call_operand.vmem [shape: f32[4,1], index: 4, kind: input, shape index: {}]   ;;  %s833_s5 = inlined_call_operand.vmem [shape: f32[2,4,256], index: 5, kind: output, shape index: {}]  }
   0x1   :  { %s736_s20 = smov 0   ;;  %s738_s21 = smov 0  }
   0x2   :  { %s740_s22 = smov 0  }
   0x3 LB: > { %s24_s23 = sadd.s32 1, %s683_s20  ;;  %s27_s24 = sadd.s32 1, %s687_s21  ;;  %s691_s22 = sphi %s740_s22, %s15_s22   ;;  %s687_s21 = sphi %s738_s21, %s841_s21   ;;  %s683_s20 = sphi %s736_s20, %s840_s20   ;;  %s679_s19 = sphi %s734_s19, %s839_s19   ;;  %s675_s18 = sphi %s732_s18, %s838_s18  }
   0x4   : > { %p25_p0 = scmp.ge.s32.totalorder %s24_s23, 2  ;;  %p577_p1 = scmp.ge.s32.totalorder %s691_s22, 1 }
   0x5   : > { %p206_p2 = scmp.lt.s32.totalorder %s691_s22, 5 }
   0x6   : > { %s843_s23 = smov (%p25_p0, %s24_s23), 0  ;;  %s845_s24 = smov (!%p25_p0, %s27_s24), %s687_s21 }
   0x7   : > { %p207_p3 = pnand %p577_p1, %p206_p2  ;;  %p29_p4 = scmp.ge.s32.totalorder %s845_s24, 2 }
   0x8   : > { %p240_p5 = scmp.lt.s32.totalorder (!%p207_p3), %s679_s19, 1  ;;  %p242_p6 = scmp.lt.s32.totalorder (!%p207_p3), %s675_s18, 1  ;;  %v693_v0 = vmov (!%p207_p3), 0.0   ;;  %vm694_vm0 = vmmov (!%p207_p3), 0   ;;  %v258_v1 = vld [vmem:[%s830_s2] sm:$0xf] (!%p207_p3)  ;;  %v342_v9 = vlaneseq (!%p207_p3) }
   0x9   : > { %s847_s24 = smov (%p29_p4, %s845_s24), 0  ;;  %210 = sbr.rel (%p207_p3) target bundleno = 714 (0x2ca), region = 40 }
   0xa   : > { %592 = vmatprep.subr.mxu0 (!%p207_p3), %v693_v0  ;;  %594 = vmatprep.mubr.msk.f32.mxu0 (!%p207_p3), %vm694_vm0, %v693_v0  ;;  %v695_v2 = vmov (!%p207_p3), 0   ;;  %vm268_vm1 = vcmask (!%p207_p3), 1042432   ;;  %v257_v3 = vld [vmem:[%s829_s1] sm:$0xf] (!%p207_p3)  ;;  %vm264_vm2 = vcmask (!%p207_p3), 23552   ;;  %s696_s10 = smov (!%p207_p3), 1  }
   0xb   : > { %651 = vset.pattern.permute.xlu0 (!%p207_p3), %v695_v2  ;;  %597 = vmatprep.subr.mxu1 (!%p207_p3), %v693_v0  ;;  %s697_s11 = smov (!%p207_p3), 127   ;;  %v343_v10 = vand.u32 (!%p207_p3), 127, %v342_v9  ;;  %s698_s12 = smov (!%p207_p3), 16   ;;  %v700_v19 = vmov (!%p207_p3), 3.0   ;;  %v701_v21 = vmov (!%p207_p3), 1.0   ;;  %vm411_vm5 = vcmask (!%p207_p3), 1043456  }
   0xc   : > { %261 = vperm.xlu0 (!%p207_p3), %651, %v258_v1   ;;  %599 = vmatprep.mubr.msk.f32.mxu1 (!%p207_p3), %vm694_vm0, %v693_v0  ;;  %s699_s13 = smov (!%p207_p3), 112   ;;  %v400_v28 = vld [vmem:[%s831_s3] sm:$0xf] (!%p207_p3)  ;;  %vm407_vm6 = vcmask (!%p207_p3), 31744  }
   0xd   : > { %652 = vset.pattern.permute.xlu1 (!%p207_p3), %v695_v2  ;;  %v360_v11 = vand.u32 (!%p207_p3), 1, %v343_v10  ;;  %v348_v17 = vand.u32 (!%p207_p3), 31, %v343_v10  ;;  %v401_v30 = vld [vmem:[%s832_s4] sm:$0xf] (!%p207_p3) }
   0xf   : > { %vm778_vm3 = vcmp.eq.s32.totalorder (!%p207_p3), %v360_v11, 0  ;;  %vm784_vm4 = vcmp.lt.s32.totalorder (!%p207_p3), %v348_v17, 16 }
  0x10   : > { %s849_s19 = smov (!%p240_p5, %s679_s19), 1  ;;  %s851_s18 = smov (!%p242_p6, %s675_s18), 1  ;;  %v382_v20 = vsel %vm778_vm3, 4.0, %v700_v19  ;;  %v383_v22 = vsel %vm778_vm3, 2.0, %v701_v21 }
  0x11   : > { %s578_s27 = sshll.u32 %s849_s19, 1  ;;  %v384_v27 = vsel %vm784_vm4, %v382_v20, %v383_v22 }
  0x12   : > { %s765_s28 = sadd.s32 %s578_s27, %s851_s18 }
  0x13   : > { %s579_s29 = sshll.u32 %s765_s28, 2 }
  0x14   : > { %s247_s7 = scalar_lea.vmem %s828_s0, %s579_s29  ;;  %s255_s25 = scalar_lea.vmem %s833_s5, %s579_s29 }
  0x15   : > { %v256_v4 = vld [vmem:[%s247_s7] sm:$0x7] }
  0x16   : > { %593 = vmatpush3.msk.msra.mxu0 %vm268_vm1, %v256_v4 }
  0x17   : > { %595 = vmatmul.mubr.msk.f32.vlgmr.msra.gmra.mrb[0].mxu0 %vm264_vm2, %v257_v3 }
  0x8b   : > { %v262_v5 = vpop.permute.xlu0 %261 }
  0xea   : > { %v338_v6 = vpop.f32.mrb[0].mxu0 }
  0xeb   : > { %v339_v7 = vadd.f32 %v338_v6, %v262_v5  ;;  %v596_v8 = vpop.f32.mrb[1].mxu0 }
  0xed   : > { %372 = vrot.lane.b32.xlu1 %v339_v7, %s696_s10  ;;  %370 = vrot.lane.b32.xlu0 %v339_v7, %s697_s11 }
 0x15f   : > { %v373_v13 = vpop.permute.xlu1 %372  ;;  %v371_v14 = vpop.permute.xlu0 %370 }
 0x160   : > { %v374_v15 = vsel %vm778_vm3, %v371_v14, %v373_v13 }
 0x161   : > { %v375_v16 = vmax.f32 %v339_v7, %v374_v15 }
 0x163   : > { %378 = vrot.lane.b32.xlu0 %v375_v16, %s698_s12  ;;  %376 = vrot.lane.b32.xlu1 %v375_v16, %s699_s13 }
 0x1d5   : > { %v379_v23 = vpop.permute.xlu0 %378  ;;  %v377_v24 = vpop.permute.xlu1 %376 }
 0x1d6   : > { %v380_v25 = vsel %vm784_vm4, %v377_v24, %v379_v23 }
 0x1d7   : > { %v381_v26 = vmax.f32 %v375_v16, %v380_v25 }
 0x1d9   : > { %598 = vmatpush3.msk.msra.mxu1 %vm411_vm5, %v381_v26  ;;  %vm385_vm7 = vcmp.eq.f32.partialorder %v339_v7, %v381_v26 }
 0x1da   : > { %v386_v29 = vsel %vm385_vm7, %v384_v27, 0.0  ;;  %600 = vmatmul.mubr.msk.f32.vlgmr.msra.gmra.mrb[0].mxu1 %vm407_vm6, %v400_v28 }
 0x1db   : > { %389 = vrot.lane.b32.xlu0 %v386_v29, %s696_s10  ;;  %387 = vrot.lane.b32.xlu1 %v386_v29, %s697_s11 }
 0x1df   : > { %404 = vperm.xlu1 %652, %v401_v30  }
 0x24d   : > { %v390_v31 = vpop.permute.xlu0 %389  ;;  %v388_v32 = vpop.permute.xlu1 %387 }
 0x24e   : > { %v391_v33 = vsel %vm778_vm3, %v388_v32, %v390_v31 }
 0x24f   : > { %v392_v34 = vmax.f32 %v386_v29, %v391_v33 }
 0x251   : > { %395 = vrot.lane.b32.xlu1 %v392_v34, %s698_s12  ;;  %393 = vrot.lane.b32.xlu0 %v392_v34, %s699_s13 }
 0x25e   : > { %v405_v37 = vpop.permute.xlu1 %404 }
 0x2ad   : > { %v481_v35 = vpop.f32.mrb[0].mxu1 }
 0x2ae   : > { %v601_v36 = vpop.f32.mrb[1].mxu1  ;;  %v482_v42 = vadd.f32 %v481_v35, %v405_v37 }
 0x2c3   : > { %v394_v38 = vpop.permute.xlu0 %393  ;;  %v396_v39 = vpop.permute.xlu1 %395 }
 0x2c4   : > { %v397_v40 = vsel %vm784_vm4, %v394_v38, %v396_v39 }
 0x2c5   : > { %v398_v41 = vmax.f32 %v392_v34, %v397_v40 }
 0x2c7   : > { %vm399_vm8 = vcmp.eq.f32.partialorder %v386_v29, %v398_v41 }
 0x2c8   : > { %v485_v43 = vsel %vm399_vm8, %v482_v42, 0.0 }
 0x2c9   : > { %486 = vst [vmem:[%s255_s25] sm:$0xf] %v485_v43 }
 0x2ca PF: > { %s15_s22 = sadd.s32 1, %s691_s22   ;;  %s838_s18 = smov %s683_s20 }
 0x2cb   : > { %p12_p7 = scmp.ge.s32.totalorder %s15_s22, 6   ;;  %s839_s19 = smov %s687_s21 }
 0x2cc   : > { %s840_s20 = smov %s843_s23  ;;  %s841_s21 = smov %s847_s24 }
 0x2cd   :  { %14 = sbr.rel (!%p12_p7) target bundleno = 3 (0x3), region = 70 }

</bundles_post_ra>
